<compile_context>
chip_gen: v6e
topology: v6e:2x2x1
jax: 0.10.0
libtpu: 0.0.40
codegen_flags: <defaults>
</compile_context>

<pallas_src>
import functools

import jax
import jax.numpy as jnp
from jax import lax
from jax.experimental import pallas as pl
from jax.experimental.pallas import tpu as pltpu

EPS = 1e-5          # InstanceNorm2d default eps
NEG_SLOPE = 0.01    # LeakyReLU negative_slope
K = 3               # kernel size
PAD = 1             # get_padding(3, 1)
LANE_PAD = 128      # flat halo width (aligned interior writes; only needs >= W+1)


def _conv_block_kernel(x_ref, w1_ref, w2_ref, prm_ref, o_ref,
                       pad1_ref, pad2_ref, *, H, W):
    """Fused ConvBlock forward for one batch element, channel-major layout.

    x_ref    : (1, Cin, H*W)            NCHW input, flattened spatial (lane-dense)
    w1_ref   : (K*K, Cout, Cin)         layer-1 per-tap weights
    w2_ref   : (K*K, Cout, Cout)        layer-2 per-tap weights
    prm_ref  : (Cout, 6)                columns: [b1, g1, be1, b2, g2, be2]
    o_ref    : (1, Cout, H*W)           channel-major output (lane-dense store)
    pad1_ref : (Cin,  128+H*W+128) f32  flat "same"-padded layer-1 input (VMEM)
    pad2_ref : (Cout, 128+H*W+128) f32  flat "same"-padded layer-2 input (VMEM)
    """
    HW = H * W
    f32 = jnp.float32
    woff = (pad1_ref.shape[-1] - HW) // 2          # = LANE_PAD

    # Column-position masks for the left/right "same" boundary (shared by both layers).
    col = lax.broadcasted_iota(jnp.int32, (1, HW), 1)
    wpos = col % W
    mask_l = wpos >= 1            # valid positions for tap dw = -1 (kw == 0)
    mask_r = wpos < (W - 1)       # valid positions for tap dw = +1 (kw == K-1)

    def write_pad(pad_ref, val):
        # Zero only the halo slabs (aligned, full-lane stores); interior overwritten.
        zero = jnp.zeros((pad_ref.shape[0], woff), f32)
        pad_ref[:, :woff] = zero
        pad_ref[:, woff + HW:] = zero
        pad_ref[:, woff:woff + HW] = val

    def conv(pad_ref, w_ref):
        # 9 per-tap MXU matmuls accumulated in f32; shifted views are static
        # lane-slices of the flat-padded scratch (top/bottom rows fall in the
        # zero halo; left/right columns are masked out).
        acc = None
        for kh in range(K):
            for kw in range(K):
                off = (kh - 1) * W + (kw - 1)
                xt = pad_ref[:, woff + off:woff + off + HW]      # (Cin_l, HW)
                if kw == 0:
                    xt = jnp.where(mask_l, xt, 0.0)
                elif kw == K - 1:
                    xt = jnp.where(mask_r, xt, 0.0)
                wt = w_ref[kh * K + kw]                          # (Cout, Cin_l)
                contrib = jnp.dot(wt, xt, preferred_element_type=f32)
                acc = contrib if acc is None else acc + contrib
        return acc                                               # (Cout, HW) f32

    def norm_act(y, base):
        # y: (Cout, HW) f32, channels on sublanes.  One-pass per-channel stats.
        b = prm_ref[:, base + 0:base + 1]       # (Cout, 1)
        g = prm_ref[:, base + 1:base + 2]
        be = prm_ref[:, base + 2:base + 3]
        y = y + b                               # conv bias
        s = jnp.sum(y, axis=1, keepdims=True)
        ss = jnp.sum(y * y, axis=1, keepdims=True)
        mean = s * (1.0 / HW)
        var = ss * (1.0 / HW) - mean * mean     # biased variance
        scale = lax.rsqrt(var + EPS) * g
        shift = be - mean * scale
        y = y * scale + shift
        return jnp.where(y >= 0.0, y, NEG_SLOPE * y)   # LeakyReLU

    # ---- layer 1
    write_pad(pad1_ref, x_ref[0].astype(f32))
    y1 = norm_act(conv(pad1_ref, w1_ref), 0)           # (Cout, HW)

    # ---- layer 2: intermediate never leaves VMEM/vregs
    write_pad(pad2_ref, y1)
    y2 = norm_act(conv(pad2_ref, w2_ref), 3)           # (Cout, HW)

    o_ref[0] = y2.astype(o_ref.dtype)


def conv_block(x_nchw, params1, params2):
    """ConvBlock.forward. NCHW in/out; one fused pallas_call, no HBM transposes."""
    N, Cin, H, W = x_nchw.shape
    w1, b1, g1, be1 = params1    # w: (Cout, Cin,  K, K) OIHW (PyTorch layout)
    w2, b2, g2, be2 = params2    # w: (Cout, Cout, K, K)
    Cout = w1.shape[0]
    HW = H * W
    HWP = HW + 2 * LANE_PAD

    # Metadata-only reshape: NCHW is contiguous, so (N,C,H,W) -> (N,C,H*W) is free.
    x2 = x_nchw.reshape(N, Cin, HW)

    # Tiny per-tap weight tables (constant-folded under jit).
    w1_taps = jnp.transpose(w1, (2, 3, 0, 1)).reshape(K * K, Cout, Cin)
    w2_taps = jnp.transpose(w2, (2, 3, 0, 1)).reshape(K * K, Cout, Cout)
    # bias/gamma/beta of both layers packed per-channel: (Cout, 6).
    prm = jnp.stack([b1, g1, be1, b2, g2, be2], axis=1)

    kernel = functools.partial(_conv_block_kernel, H=H, W=W)

    out = pl.pallas_call(
        kernel,
        out_shape=jax.ShapeDtypeStruct((N, Cout, HW), x_nchw.dtype),
        grid_spec=pltpu.PrefetchScalarGridSpec(
            num_scalar_prefetch=0,
            grid=(N,),
            in_specs=[
                pl.BlockSpec((1, Cin, HW), lambda n: (n, 0, 0)),
                pl.BlockSpec((K * K, Cout, Cin), lambda n: (0, 0, 0)),
                pl.BlockSpec((K * K, Cout, Cout), lambda n: (0, 0, 0)),
                pl.BlockSpec((Cout, 6), lambda n: (0, 0)),
            ],
            out_specs=pl.BlockSpec((1, Cout, HW), lambda n: (n, 0, 0)),
            scratch_shapes=[
                pltpu.VMEM((Cin, HWP), jnp.float32),
                pltpu.VMEM((Cout, HWP), jnp.float32),
            ],
        ),
        compiler_params=pltpu.CompilerParams(
            dimension_semantics=("parallel",)),
    )(x2, w1_taps, w2_taps, prm)

    # Metadata-only reshape back to NCHW.
    return out.reshape(N, Cout, H, W)


def _init_layer_params(key, cin, cout):
    kw_, kb, kg, kbe = jax.random.split(key, 4)
    fan_in = cin * K * K
    w = jax.random.normal(kw_, (cout, cin, K, K), jnp.float32) / jnp.sqrt(fan_in)
    b = 0.01 * jax.random.normal(kb, (cout,), jnp.float32)
    gamma = 1.0 + 0.1 * jax.random.normal(kg, (cout,), jnp.float32)
    beta = 0.1 * jax.random.normal(kbe, (cout,), jnp.float32)
    return w, b, gamma, beta


def _reference(x_nchw, params1, params2):
    """Pure-JAX reference (NCHW / OIHW) mirroring the PyTorch forward."""
    def layer(x, w, b, gamma, beta):
        y = lax.conv_general_dilated(
            x, w, window_strides=(1, 1), padding=((PAD, PAD), (PAD, PAD)),
            dimension_numbers=("NCHW", "OIHW", "NCHW"))
        y = y + b.reshape(1, -1, 1, 1)
        mean = jnp.mean(y, axis=(2, 3), keepdims=True)
        var = jnp.mean((y - mean) ** 2, axis=(2, 3), keepdims=True)
        y = (y - mean) * lax.rsqrt(var + EPS)
        y = y * gamma.reshape(1, -1, 1, 1) + beta.reshape(1, -1, 1, 1)
        return jnp.where(y >= 0, y, NEG_SLOPE * y)

    return layer(layer(x_nchw, *params1), *params2)


if __name__ == "__main__":
    key = jax.random.PRNGKey(0)
    kx, k1, k2 = jax.random.split(key, 3)

    N, Cin, Cout, H, W = 2, 4, 8, 16, 16
    x = jax.random.normal(kx, (N, Cin, H, W), jnp.float32)

    params1 = _init_layer_params(k1, Cin, Cout)   # ConvLayer(in=4, out=8, k=3, s=1)
    params2 = _init_layer_params(k2, Cout, Cout)  # ConvLayer(in=8, out=8, k=3, s=1)

    out = jax.block_until_ready(conv_block(x, params1, params2))

    ref = _reference(x, params1, params2)
    assert out.shape == (N, Cout, H, W)
    assert jnp.allclose(out, ref, atol=1e-4, rtol=1e-4)

    print("KERNEL_OK")
</pallas_src>

<mosaic_0001>
module attributes {stable_mosaic.version = 11 : i64} {
  func.func @_conv_block_kernel(%arg0: i32, %arg1: memref<1x4x256xf32, #tpu.memory_space<vmem>>, %arg2: memref<9x8x4xf32, #tpu.memory_space<vmem>>, %arg3: memref<9x8x8xf32, #tpu.memory_space<vmem>>, %arg4: memref<8x6xf32, #tpu.memory_space<vmem>>, %arg5: memref<1x8x256xf32, #tpu.memory_space<vmem>>, %arg6: memref<4x512xf32, #tpu.memory_space<vmem>>, %arg7: memref<8x512xf32, #tpu.memory_space<vmem>>) attributes {dimension_semantics = [#tpu.dimension_semantics<parallel>], iteration_bounds = array<i64: 2>, scalar_prefetch = 0 : i64, scratch_operands = 2 : i64, tpu.core_type = #tpu.core_type<tc>, window_params = [{transform_indices = @transform_0, window_bounds = array<i64: 1, 4, 256>}, {pipeline_mode = #tpu.pipeline_mode<synchronous>, transform_indices = @transform_1, window_bounds = array<i64: 9, 8, 4>}, {pipeline_mode = #tpu.pipeline_mode<synchronous>, transform_indices = @transform_2, window_bounds = array<i64: 9, 8, 8>}, {pipeline_mode = #tpu.pipeline_mode<synchronous>, transform_indices = @transform_3, window_bounds = array<i64: 8, 6>}, {transform_indices = @transform_4, window_bounds = array<i64: 1, 8, 256>}]} {
    %0 = tpu.iota {dimensions = array<i32: 1>} : vector<1x256xi32>
    %c16_i32 = arith.constant 16 : i32
    %c0_i32 = arith.constant 0 : i32
    %1 = arith.cmpi eq, %c16_i32, %c0_i32 : i32
    %c1_i32 = arith.constant 1 : i32
    %2 = arith.select %1, %c1_i32, %c16_i32 : i32
    %3 = vector.broadcast %2 : i32 to vector<1x256xi32>
    %4 = arith.remsi %0, %3 : vector<1x256xi32>
    %c0_i32_0 = arith.constant 0 : i32
    %5 = vector.broadcast %c0_i32_0 : i32 to vector<1x256xi32>
    %6 = arith.cmpi ne, %4, %5 : vector<1x256xi32>
    %c0_i32_1 = arith.constant 0 : i32
    %7 = vector.broadcast %c0_i32_1 : i32 to vector<1x256xi32>
    %8 = arith.cmpi slt, %4, %7 : vector<1x256xi32>
    %c0_i32_2 = arith.constant 0 : i32
    %9 = arith.cmpi slt, %2, %c0_i32_2 : i32
    %10 = vector.broadcast %9 : i1 to vector<1x256xi1>
    %11 = vector.broadcast %10 : vector<1x256xi1> to vector<1x256xi1>
    %12 = arith.xori %8, %11 : vector<1x256xi1>
    %13 = arith.andi %12, %6 : vector<1x256xi1>
    %14 = vector.broadcast %2 : i32 to vector<1x256xi32>
    %15 = arith.addi %4, %14 : vector<1x256xi32>
    %16 = arith.select %13, %15, %4 : vector<1x256xi1>, vector<1x256xi32>
    %c1_i32_3 = arith.constant 1 : i32
    %17 = vector.broadcast %c1_i32_3 : i32 to vector<1x256xi32>
    %18 = arith.cmpi sge, %16, %17 : vector<1x256xi32>
    %c15_i32 = arith.constant 15 : i32
    %19 = vector.broadcast %c15_i32 : i32 to vector<1x256xi32>
    %20 = arith.cmpi slt, %16, %19 : vector<1x256xi32>
    %c0 = arith.constant 0 : index
    %c0_4 = arith.constant 0 : index
    %c0_5 = arith.constant 0 : index
    %21 = vector.load %arg1[%c0, %c0_4, %c0_5] : memref<1x4x256xf32, #tpu.memory_space<vmem>>, vector<1x4x256xf32>
    %22 = vector.shape_cast %21 : vector<1x4x256xf32> to vector<4x256xf32>
    %cst = arith.constant 0.000000e+00 : f32
    %23 = vector.broadcast %cst : f32 to vector<4x128xf32>
    %c0_6 = arith.constant 0 : index
    %c0_7 = arith.constant 0 : index
    %24 = vector.load %arg6[%c0_6, %c0_7] : memref<4x512xf32, #tpu.memory_space<vmem>>, vector<4x128xf32>
    tpu.vector_store %arg6[%c0_6, %c0_7], %23 {strides = array<i32>} : memref<4x512xf32, #tpu.memory_space<vmem>>, vector<4x128xf32>,
    %c0_8 = arith.constant 0 : index
    %c384 = arith.constant 384 : index
    %25 = vector.load %arg6[%c0_8, %c384] : memref<4x512xf32, #tpu.memory_space<vmem>>, vector<4x128xf32>
    tpu.vector_store %arg6[%c0_8, %c384], %23 {strides = array<i32>} : memref<4x512xf32, #tpu.memory_space<vmem>>, vector<4x128xf32>,
    %c0_9 = arith.constant 0 : index
    %c128 = arith.constant 128 : index
    %26 = vector.load %arg6[%c0_9, %c128] : memref<4x512xf32, #tpu.memory_space<vmem>>, vector<4x256xf32>
    tpu.vector_store %arg6[%c0_9, %c128], %22 {strides = array<i32>} : memref<4x512xf32, #tpu.memory_space<vmem>>, vector<4x256xf32>,
    %c0_10 = arith.constant 0 : index
    %c111 = arith.constant 111 : index
    %27 = vector.load %arg6[%c0_10, %c111] : memref<4x512xf32, #tpu.memory_space<vmem>>, vector<4x256xf32>
    %cst_11 = arith.constant 0.000000e+00 : f32
    %28 = vector.shape_cast %18 : vector<1x256xi1> to vector<1x256xi1>
    %29 = vector.broadcast %28 : vector<1x256xi1> to vector<4x256xi1>
    %30 = vector.broadcast %cst_11 : f32 to vector<4x256xf32>
    %31 = arith.select %29, %27, %30 : vector<4x256xi1>, vector<4x256xf32>
    %c0_12 = arith.constant 0 : index
    %c0_13 = arith.constant 0 : index
    %c0_14 = arith.constant 0 : index
    %32 = vector.load %arg2[%c0_12, %c0_13, %c0_14] : memref<9x8x4xf32, #tpu.memory_space<vmem>>, vector<1x8x4xf32>
    %33 = vector.shape_cast %32 : vector<1x8x4xf32> to vector<8x4xf32>
    %cst_15 = arith.constant dense<0.000000e+00> : vector<8x256xf32>
    %34 = tpu.matmul %33, %31, %cst_15 {dimension_numbers = #tpu.dot_dimension_numbers<[1], [0], [0], [1], [0, 0, 1, 1], [], []>} : vector<8x4xf32>, vector<4x256xf32>, vector<8x256xf32> -> vector<8x256xf32>
    %c0_16 = arith.constant 0 : index
    %c112 = arith.constant 112 : index
    %35 = vector.load %arg6[%c0_16, %c112] : memref<4x512xf32, #tpu.memory_space<vmem>>, vector<4x256xf32>
    %c1 = arith.constant 1 : index
    %c0_17 = arith.constant 0 : index
    %c0_18 = arith.constant 0 : index
    %36 = vector.load %arg2[%c1, %c0_17, %c0_18] : memref<9x8x4xf32, #tpu.memory_space<vmem>>, vector<1x8x4xf32>
    %37 = vector.shape_cast %36 : vector<1x8x4xf32> to vector<8x4xf32>
    %cst_19 = arith.constant dense<0.000000e+00> : vector<8x256xf32>
    %38 = tpu.matmul %37, %35, %cst_19 {dimension_numbers = #tpu.dot_dimension_numbers<[1], [0], [0], [1], [0, 0, 1, 1], [], []>} : vector<8x4xf32>, vector<4x256xf32>, vector<8x256xf32> -> vector<8x256xf32>
    %39 = arith.addf %34, %38 : vector<8x256xf32>
    %c0_20 = arith.constant 0 : index
    %c113 = arith.constant 113 : index
    %40 = vector.load %arg6[%c0_20, %c113] : memref<4x512xf32, #tpu.memory_space<vmem>>, vector<4x256xf32>
    %cst_21 = arith.constant 0.000000e+00 : f32
    %41 = vector.shape_cast %20 : vector<1x256xi1> to vector<1x256xi1>
    %42 = vector.broadcast %41 : vector<1x256xi1> to vector<4x256xi1>
    %43 = vector.broadcast %cst_21 : f32 to vector<4x256xf32>
    %44 = arith.select %42, %40, %43 : vector<4x256xi1>, vector<4x256xf32>
    %c2 = arith.constant 2 : index
    %c0_22 = arith.constant 0 : index
    %c0_23 = arith.constant 0 : index
    %45 = vector.load %arg2[%c2, %c0_22, %c0_23] : memref<9x8x4xf32, #tpu.memory_space<vmem>>, vector<1x8x4xf32>
    %46 = vector.shape_cast %45 : vector<1x8x4xf32> to vector<8x4xf32>
    %cst_24 = arith.constant dense<0.000000e+00> : vector<8x256xf32>
    %47 = tpu.matmul %46, %44, %cst_24 {dimension_numbers = #tpu.dot_dimension_numbers<[1], [0], [0], [1], [0, 0, 1, 1], [], []>} : vector<8x4xf32>, vector<4x256xf32>, vector<8x256xf32> -> vector<8x256xf32>
    %48 = arith.addf %39, %47 : vector<8x256xf32>
    %c0_25 = arith.constant 0 : index
    %c127 = arith.constant 127 : index
    %49 = vector.load %arg6[%c0_25, %c127] : memref<4x512xf32, #tpu.memory_space<vmem>>, vector<4x256xf32>
    %cst_26 = arith.constant 0.000000e+00 : f32
    %50 = vector.shape_cast %18 : vector<1x256xi1> to vector<1x256xi1>
    %51 = vector.broadcast %50 : vector<1x256xi1> to vector<4x256xi1>
    %52 = vector.broadcast %cst_26 : f32 to vector<4x256xf32>
    %53 = arith.select %51, %49, %52 : vector<4x256xi1>, vector<4x256xf32>
    %c3 = arith.constant 3 : index
    %c0_27 = arith.constant 0 : index
    %c0_28 = arith.constant 0 : index
    %54 = vector.load %arg2[%c3, %c0_27, %c0_28] : memref<9x8x4xf32, #tpu.memory_space<vmem>>, vector<1x8x4xf32>
    %55 = vector.shape_cast %54 : vector<1x8x4xf32> to vector<8x4xf32>
    %cst_29 = arith.constant dense<0.000000e+00> : vector<8x256xf32>
    %56 = tpu.matmul %55, %53, %cst_29 {dimension_numbers = #tpu.dot_dimension_numbers<[1], [0], [0], [1], [0, 0, 1, 1], [], []>} : vector<8x4xf32>, vector<4x256xf32>, vector<8x256xf32> -> vector<8x256xf32>
    %57 = arith.addf %48, %56 : vector<8x256xf32>
    %c0_30 = arith.constant 0 : index
    %c128_31 = arith.constant 128 : index
    %58 = vector.load %arg6[%c0_30, %c128_31] : memref<4x512xf32, #tpu.memory_space<vmem>>, vector<4x256xf32>
    %c4 = arith.constant 4 : index
    %c0_32 = arith.constant 0 : index
    %c0_33 = arith.constant 0 : index
    %59 = vector.load %arg2[%c4, %c0_32, %c0_33] : memref<9x8x4xf32, #tpu.memory_space<vmem>>, vector<1x8x4xf32>
    %60 = vector.shape_cast %59 : vector<1x8x4xf32> to vector<8x4xf32>
    %cst_34 = arith.constant dense<0.000000e+00> : vector<8x256xf32>
    %61 = tpu.matmul %60, %58, %cst_34 {dimension_numbers = #tpu.dot_dimension_numbers<[1], [0], [0], [1], [0, 0, 1, 1], [], []>} : vector<8x4xf32>, vector<4x256xf32>, vector<8x256xf32> -> vector<8x256xf32>
    %62 = arith.addf %57, %61 : vector<8x256xf32>
    %c0_35 = arith.constant 0 : index
    %c129 = arith.constant 129 : index
    %63 = vector.load %arg6[%c0_35, %c129] : memref<4x512xf32, #tpu.memory_space<vmem>>, vector<4x256xf32>
    %cst_36 = arith.constant 0.000000e+00 : f32
    %64 = vector.shape_cast %20 : vector<1x256xi1> to vector<1x256xi1>
    %65 = vector.broadcast %64 : vector<1x256xi1> to vector<4x256xi1>
    %66 = vector.broadcast %cst_36 : f32 to vector<4x256xf32>
    %67 = arith.select %65, %63, %66 : vector<4x256xi1>, vector<4x256xf32>
    %c5 = arith.constant 5 : index
    %c0_37 = arith.constant 0 : index
    %c0_38 = arith.constant 0 : index
    %68 = vector.load %arg2[%c5, %c0_37, %c0_38] : memref<9x8x4xf32, #tpu.memory_space<vmem>>, vector<1x8x4xf32>
    %69 = vector.shape_cast %68 : vector<1x8x4xf32> to vector<8x4xf32>
    %cst_39 = arith.constant dense<0.000000e+00> : vector<8x256xf32>
    %70 = tpu.matmul %69, %67, %cst_39 {dimension_numbers = #tpu.dot_dimension_numbers<[1], [0], [0], [1], [0, 0, 1, 1], [], []>} : vector<8x4xf32>, vector<4x256xf32>, vector<8x256xf32> -> vector<8x256xf32>
    %71 = arith.addf %62, %70 : vector<8x256xf32>
    %c0_40 = arith.constant 0 : index
    %c143 = arith.constant 143 : index
    %72 = vector.load %arg6[%c0_40, %c143] : memref<4x512xf32, #tpu.memory_space<vmem>>, vector<4x256xf32>
    %cst_41 = arith.constant 0.000000e+00 : f32
    %73 = vector.shape_cast %18 : vector<1x256xi1> to vector<1x256xi1>
    %74 = vector.broadcast %73 : vector<1x256xi1> to vector<4x256xi1>
    %75 = vector.broadcast %cst_41 : f32 to vector<4x256xf32>
    %76 = arith.select %74, %72, %75 : vector<4x256xi1>, vector<4x256xf32>
    %c6 = arith.constant 6 : index
    %c0_42 = arith.constant 0 : index
    %c0_43 = arith.constant 0 : index
    %77 = vector.load %arg2[%c6, %c0_42, %c0_43] : memref<9x8x4xf32, #tpu.memory_space<vmem>>, vector<1x8x4xf32>
    %78 = vector.shape_cast %77 : vector<1x8x4xf32> to vector<8x4xf32>
    %cst_44 = arith.constant dense<0.000000e+00> : vector<8x256xf32>
    %79 = tpu.matmul %78, %76, %cst_44 {dimension_numbers = #tpu.dot_dimension_numbers<[1], [0], [0], [1], [0, 0, 1, 1], [], []>} : vector<8x4xf32>, vector<4x256xf32>, vector<8x256xf32> -> vector<8x256xf32>
    %80 = arith.addf %71, %79 : vector<8x256xf32>
    %c0_45 = arith.constant 0 : index
    %c144 = arith.constant 144 : index
    %81 = vector.load %arg6[%c0_45, %c144] : memref<4x512xf32, #tpu.memory_space<vmem>>, vector<4x256xf32>
    %c7 = arith.constant 7 : index
    %c0_46 = arith.constant 0 : index
    %c0_47 = arith.constant 0 : index
    %82 = vector.load %arg2[%c7, %c0_46, %c0_47] : memref<9x8x4xf32, #tpu.memory_space<vmem>>, vector<1x8x4xf32>
    %83 = vector.shape_cast %82 : vector<1x8x4xf32> to vector<8x4xf32>
    %cst_48 = arith.constant dense<0.000000e+00> : vector<8x256xf32>
    %84 = tpu.matmul %83, %81, %cst_48 {dimension_numbers = #tpu.dot_dimension_numbers<[1], [0], [0], [1], [0, 0, 1, 1], [], []>} : vector<8x4xf32>, vector<4x256xf32>, vector<8x256xf32> -> vector<8x256xf32>
    %85 = arith.addf %80, %84 : vector<8x256xf32>
    %c0_49 = arith.constant 0 : index
    %c145 = arith.constant 145 : index
    %86 = vector.load %arg6[%c0_49, %c145] : memref<4x512xf32, #tpu.memory_space<vmem>>, vector<4x256xf32>
    %cst_50 = arith.constant 0.000000e+00 : f32
    %87 = vector.shape_cast %20 : vector<1x256xi1> to vector<1x256xi1>
    %88 = vector.broadcast %87 : vector<1x256xi1> to vector<4x256xi1>
    %89 = vector.broadcast %cst_50 : f32 to vector<4x256xf32>
    %90 = arith.select %88, %86, %89 : vector<4x256xi1>, vector<4x256xf32>
    %c8 = arith.constant 8 : index
    %c0_51 = arith.constant 0 : index
    %c0_52 = arith.constant 0 : index
    %91 = vector.load %arg2[%c8, %c0_51, %c0_52] : memref<9x8x4xf32, #tpu.memory_space<vmem>>, vector<1x8x4xf32>
    %92 = vector.shape_cast %91 : vector<1x8x4xf32> to vector<8x4xf32>
    %cst_53 = arith.constant dense<0.000000e+00> : vector<8x256xf32>
    %93 = tpu.matmul %92, %90, %cst_53 {dimension_numbers = #tpu.dot_dimension_numbers<[1], [0], [0], [1], [0, 0, 1, 1], [], []>} : vector<8x4xf32>, vector<4x256xf32>, vector<8x256xf32> -> vector<8x256xf32>
    %94 = arith.addf %85, %93 : vector<8x256xf32>
    %c0_54 = arith.constant 0 : index
    %c0_55 = arith.constant 0 : index
    %95 = vector.load %arg4[%c0_54, %c0_55] : memref<8x6xf32, #tpu.memory_space<vmem>>, vector<8x1xf32>
    %c0_56 = arith.constant 0 : index
    %c1_57 = arith.constant 1 : index
    %96 = vector.load %arg4[%c0_56, %c1_57] : memref<8x6xf32, #tpu.memory_space<vmem>>, vector<8x1xf32>
    %c0_58 = arith.constant 0 : index
    %c2_59 = arith.constant 2 : index
    %97 = vector.load %arg4[%c0_58, %c2_59] : memref<8x6xf32, #tpu.memory_space<vmem>>, vector<8x1xf32>
    %98 = vector.broadcast %95 : vector<8x1xf32> to vector<8x256xf32>
    %99 = arith.addf %94, %98 : vector<8x256xf32>
    %cst_60 = arith.constant dense<0.000000e+00> : vector<8xf32>
    %100 = vector.multi_reduction <add>, %99, %cst_60 [1] : vector<8x256xf32> to vector<8xf32>
    %101 = vector.shape_cast %100 : vector<8xf32> to vector<8x1xf32>
    %102 = arith.mulf %99, %99 : vector<8x256xf32>
    %cst_61 = arith.constant dense<0.000000e+00> : vector<8xf32>
    %103 = vector.multi_reduction <add>, %102, %cst_61 [1] : vector<8x256xf32> to vector<8xf32>
    %104 = vector.shape_cast %103 : vector<8xf32> to vector<8x1xf32>
    %cst_62 = arith.constant 3.906250e-03 : f32
    %105 = vector.broadcast %cst_62 : f32 to vector<8x1xf32>
    %106 = arith.mulf %101, %105 : vector<8x1xf32>
    %cst_63 = arith.constant 3.906250e-03 : f32
    %107 = vector.broadcast %cst_63 : f32 to vector<8x1xf32>
    %108 = arith.mulf %104, %107 : vector<8x1xf32>
    %109 = arith.mulf %106, %106 : vector<8x1xf32>
    %110 = arith.subf %108, %109 : vector<8x1xf32>
    %cst_64 = arith.constant 9.99999974E-6 : f32
    %111 = vector.broadcast %cst_64 : f32 to vector<8x1xf32>
    %112 = arith.addf %110, %111 : vector<8x1xf32>
    %113 = math.rsqrt %112 : vector<8x1xf32>
    %114 = arith.mulf %113, %96 : vector<8x1xf32>
    %115 = arith.mulf %106, %114 : vector<8x1xf32>
    %116 = arith.subf %97, %115 : vector<8x1xf32>
    %117 = vector.broadcast %114 : vector<8x1xf32> to vector<8x256xf32>
    %118 = arith.mulf %99, %117 : vector<8x256xf32>
    %119 = vector.broadcast %116 : vector<8x1xf32> to vector<8x256xf32>
    %120 = arith.addf %118, %119 : vector<8x256xf32>
    %cst_65 = arith.constant 0.000000e+00 : f32
    %121 = vector.broadcast %cst_65 : f32 to vector<8x256xf32>
    %122 = arith.cmpf oge, %120, %121 : vector<8x256xf32>
    %cst_66 = arith.constant 0.00999999977 : f32
    %123 = vector.broadcast %cst_66 : f32 to vector<8x256xf32>
    %124 = arith.mulf %123, %120 : vector<8x256xf32>
    %125 = arith.select %122, %120, %124 : vector<8x256xi1>, vector<8x256xf32>
    %cst_67 = arith.constant 0.000000e+00 : f32
    %126 = vector.broadcast %cst_67 : f32 to vector<8x128xf32>
    %c0_68 = arith.constant 0 : index
    %c0_69 = arith.constant 0 : index
    %127 = vector.load %arg7[%c0_68, %c0_69] : memref<8x512xf32, #tpu.memory_space<vmem>>, vector<8x128xf32>
    tpu.vector_store %arg7[%c0_68, %c0_69], %126 {strides = array<i32>} : memref<8x512xf32, #tpu.memory_space<vmem>>, vector<8x128xf32>,
    %c0_70 = arith.constant 0 : index
    %c384_71 = arith.constant 384 : index
    %128 = vector.load %arg7[%c0_70, %c384_71] : memref<8x512xf32, #tpu.memory_space<vmem>>, vector<8x128xf32>
    tpu.vector_store %arg7[%c0_70, %c384_71], %126 {strides = array<i32>} : memref<8x512xf32, #tpu.memory_space<vmem>>, vector<8x128xf32>,
    %c0_72 = arith.constant 0 : index
    %c128_73 = arith.constant 128 : index
    %129 = vector.load %arg7[%c0_72, %c128_73] : memref<8x512xf32, #tpu.memory_space<vmem>>, vector<8x256xf32>
    tpu.vector_store %arg7[%c0_72, %c128_73], %125 {strides = array<i32>} : memref<8x512xf32, #tpu.memory_space<vmem>>, vector<8x256xf32>,
    %c0_74 = arith.constant 0 : index
    %c111_75 = arith.constant 111 : index
    %130 = vector.load %arg7[%c0_74, %c111_75] : memref<8x512xf32, #tpu.memory_space<vmem>>, vector<8x256xf32>
    %cst_76 = arith.constant 0.000000e+00 : f32
    %131 = vector.shape_cast %18 : vector<1x256xi1> to vector<1x256xi1>
    %132 = vector.broadcast %131 : vector<1x256xi1> to vector<8x256xi1>
    %133 = vector.broadcast %cst_76 : f32 to vector<8x256xf32>
    %134 = arith.select %132, %130, %133 : vector<8x256xi1>, vector<8x256xf32>
    %c0_77 = arith.constant 0 : index
    %c0_78 = arith.constant 0 : index
    %c0_79 = arith.constant 0 : index
    %135 = vector.load %arg3[%c0_77, %c0_78, %c0_79] : memref<9x8x8xf32, #tpu.memory_space<vmem>>, vector<1x8x8xf32>
    %136 = vector.shape_cast %135 : vector<1x8x8xf32> to vector<8x8xf32>
    %cst_80 = arith.constant dense<0.000000e+00> : vector<8x256xf32>
    %137 = tpu.matmul %136, %134, %cst_80 {dimension_numbers = #tpu.dot_dimension_numbers<[1], [0], [0], [1], [0, 0, 1, 1], [], []>} : vector<8x8xf32>, vector<8x256xf32>, vector<8x256xf32> -> vector<8x256xf32>
    %c0_81 = arith.constant 0 : index
    %c112_82 = arith.constant 112 : index
    %138 = vector.load %arg7[%c0_81, %c112_82] : memref<8x512xf32, #tpu.memory_space<vmem>>, vector<8x256xf32>
    %c1_83 = arith.constant 1 : index
    %c0_84 = arith.constant 0 : index
    %c0_85 = arith.constant 0 : index
    %139 = vector.load %arg3[%c1_83, %c0_84, %c0_85] : memref<9x8x8xf32, #tpu.memory_space<vmem>>, vector<1x8x8xf32>
    %140 = vector.shape_cast %139 : vector<1x8x8xf32> to vector<8x8xf32>
    %cst_86 = arith.constant dense<0.000000e+00> : vector<8x256xf32>
    %141 = tpu.matmul %140, %138, %cst_86 {dimension_numbers = #tpu.dot_dimension_numbers<[1], [0], [0], [1], [0, 0, 1, 1], [], []>} : vector<8x8xf32>, vector<8x256xf32>, vector<8x256xf32> -> vector<8x256xf32>
    %142 = arith.addf %137, %141 : vector<8x256xf32>
    %c0_87 = arith.constant 0 : index
    %c113_88 = arith.constant 113 : index
    %143 = vector.load %arg7[%c0_87, %c113_88] : memref<8x512xf32, #tpu.memory_space<vmem>>, vector<8x256xf32>
    %cst_89 = arith.constant 0.000000e+00 : f32
    %144 = vector.shape_cast %20 : vector<1x256xi1> to vector<1x256xi1>
    %145 = vector.broadcast %144 : vector<1x256xi1> to vector<8x256xi1>
    %146 = vector.broadcast %cst_89 : f32 to vector<8x256xf32>
    %147 = arith.select %145, %143, %146 : vector<8x256xi1>, vector<8x256xf32>
    %c2_90 = arith.constant 2 : index
    %c0_91 = arith.constant 0 : index
    %c0_92 = arith.constant 0 : index
    %148 = vector.load %arg3[%c2_90, %c0_91, %c0_92] : memref<9x8x8xf32, #tpu.memory_space<vmem>>, vector<1x8x8xf32>
    %149 = vector.shape_cast %148 : vector<1x8x8xf32> to vector<8x8xf32>
    %cst_93 = arith.constant dense<0.000000e+00> : vector<8x256xf32>
    %150 = tpu.matmul %149, %147, %cst_93 {dimension_numbers = #tpu.dot_dimension_numbers<[1], [0], [0], [1], [0, 0, 1, 1], [], []>} : vector<8x8xf32>, vector<8x256xf32>, vector<8x256xf32> -> vector<8x256xf32>
    %151 = arith.addf %142, %150 : vector<8x256xf32>
    %c0_94 = arith.constant 0 : index
    %c127_95 = arith.constant 127 : index
    %152 = vector.load %arg7[%c0_94, %c127_95] : memref<8x512xf32, #tpu.memory_space<vmem>>, vector<8x256xf32>
    %cst_96 = arith.constant 0.000000e+00 : f32
    %153 = vector.shape_cast %18 : vector<1x256xi1> to vector<1x256xi1>
    %154 = vector.broadcast %153 : vector<1x256xi1> to vector<8x256xi1>
    %155 = vector.broadcast %cst_96 : f32 to vector<8x256xf32>
    %156 = arith.select %154, %152, %155 : vector<8x256xi1>, vector<8x256xf32>
    %c3_97 = arith.constant 3 : index
    %c0_98 = arith.constant 0 : index
    %c0_99 = arith.constant 0 : index
    %157 = vector.load %arg3[%c3_97, %c0_98, %c0_99] : memref<9x8x8xf32, #tpu.memory_space<vmem>>, vector<1x8x8xf32>
    %158 = vector.shape_cast %157 : vector<1x8x8xf32> to vector<8x8xf32>
    %cst_100 = arith.constant dense<0.000000e+00> : vector<8x256xf32>
    %159 = tpu.matmul %158, %156, %cst_100 {dimension_numbers = #tpu.dot_dimension_numbers<[1], [0], [0], [1], [0, 0, 1, 1], [], []>} : vector<8x8xf32>, vector<8x256xf32>, vector<8x256xf32> -> vector<8x256xf32>
    %160 = arith.addf %151, %159 : vector<8x256xf32>
    %c0_101 = arith.constant 0 : index
    %c128_102 = arith.constant 128 : index
    %161 = vector.load %arg7[%c0_101, %c128_102] : memref<8x512xf32, #tpu.memory_space<vmem>>, vector<8x256xf32>
    %c4_103 = arith.constant 4 : index
    %c0_104 = arith.constant 0 : index
    %c0_105 = arith.constant 0 : index
    %162 = vector.load %arg3[%c4_103, %c0_104, %c0_105] : memref<9x8x8xf32, #tpu.memory_space<vmem>>, vector<1x8x8xf32>
    %163 = vector.shape_cast %162 : vector<1x8x8xf32> to vector<8x8xf32>
    %cst_106 = arith.constant dense<0.000000e+00> : vector<8x256xf32>
    %164 = tpu.matmul %163, %161, %cst_106 {dimension_numbers = #tpu.dot_dimension_numbers<[1], [0], [0], [1], [0, 0, 1, 1], [], []>} : vector<8x8xf32>, vector<8x256xf32>, vector<8x256xf32> -> vector<8x256xf32>
    %165 = arith.addf %160, %164 : vector<8x256xf32>
    %c0_107 = arith.constant 0 : index
    %c129_108 = arith.constant 129 : index
    %166 = vector.load %arg7[%c0_107, %c129_108] : memref<8x512xf32, #tpu.memory_space<vmem>>, vector<8x256xf32>
    %cst_109 = arith.constant 0.000000e+00 : f32
    %167 = vector.shape_cast %20 : vector<1x256xi1> to vector<1x256xi1>
    %168 = vector.broadcast %167 : vector<1x256xi1> to vector<8x256xi1>
    %169 = vector.broadcast %cst_109 : f32 to vector<8x256xf32>
    %170 = arith.select %168, %166, %169 : vector<8x256xi1>, vector<8x256xf32>
    %c5_110 = arith.constant 5 : index
    %c0_111 = arith.constant 0 : index
    %c0_112 = arith.constant 0 : index
    %171 = vector.load %arg3[%c5_110, %c0_111, %c0_112] : memref<9x8x8xf32, #tpu.memory_space<vmem>>, vector<1x8x8xf32>
    %172 = vector.shape_cast %171 : vector<1x8x8xf32> to vector<8x8xf32>
    %cst_113 = arith.constant dense<0.000000e+00> : vector<8x256xf32>
    %173 = tpu.matmul %172, %170, %cst_113 {dimension_numbers = #tpu.dot_dimension_numbers<[1], [0], [0], [1], [0, 0, 1, 1], [], []>} : vector<8x8xf32>, vector<8x256xf32>, vector<8x256xf32> -> vector<8x256xf32>
    %174 = arith.addf %165, %173 : vector<8x256xf32>
    %c0_114 = arith.constant 0 : index
    %c143_115 = arith.constant 143 : index
    %175 = vector.load %arg7[%c0_114, %c143_115] : memref<8x512xf32, #tpu.memory_space<vmem>>, vector<8x256xf32>
    %cst_116 = arith.constant 0.000000e+00 : f32
    %176 = vector.shape_cast %18 : vector<1x256xi1> to vector<1x256xi1>
    %177 = vector.broadcast %176 : vector<1x256xi1> to vector<8x256xi1>
    %178 = vector.broadcast %cst_116 : f32 to vector<8x256xf32>
    %179 = arith.select %177, %175, %178 : vector<8x256xi1>, vector<8x256xf32>
    %c6_117 = arith.constant 6 : index
    %c0_118 = arith.constant 0 : index
    %c0_119 = arith.constant 0 : index
    %180 = vector.load %arg3[%c6_117, %c0_118, %c0_119] : memref<9x8x8xf32, #tpu.memory_space<vmem>>, vector<1x8x8xf32>
    %181 = vector.shape_cast %180 : vector<1x8x8xf32> to vector<8x8xf32>
    %cst_120 = arith.constant dense<0.000000e+00> : vector<8x256xf32>
    %182 = tpu.matmul %181, %179, %cst_120 {dimension_numbers = #tpu.dot_dimension_numbers<[1], [0], [0], [1], [0, 0, 1, 1], [], []>} : vector<8x8xf32>, vector<8x256xf32>, vector<8x256xf32> -> vector<8x256xf32>
    %183 = arith.addf %174, %182 : vector<8x256xf32>
    %c0_121 = arith.constant 0 : index
    %c144_122 = arith.constant 144 : index
    %184 = vector.load %arg7[%c0_121, %c144_122] : memref<8x512xf32, #tpu.memory_space<vmem>>, vector<8x256xf32>
    %c7_123 = arith.constant 7 : index
    %c0_124 = arith.constant 0 : index
    %c0_125 = arith.constant 0 : index
    %185 = vector.load %arg3[%c7_123, %c0_124, %c0_125] : memref<9x8x8xf32, #tpu.memory_space<vmem>>, vector<1x8x8xf32>
    %186 = vector.shape_cast %185 : vector<1x8x8xf32> to vector<8x8xf32>
    %cst_126 = arith.constant dense<0.000000e+00> : vector<8x256xf32>
    %187 = tpu.matmul %186, %184, %cst_126 {dimension_numbers = #tpu.dot_dimension_numbers<[1], [0], [0], [1], [0, 0, 1, 1], [], []>} : vector<8x8xf32>, vector<8x256xf32>, vector<8x256xf32> -> vector<8x256xf32>
    %188 = arith.addf %183, %187 : vector<8x256xf32>
    %c0_127 = arith.constant 0 : index
    %c145_128 = arith.constant 145 : index
    %189 = vector.load %arg7[%c0_127, %c145_128] : memref<8x512xf32, #tpu.memory_space<vmem>>, vector<8x256xf32>
    %cst_129 = arith.constant 0.000000e+00 : f32
    %190 = vector.shape_cast %20 : vector<1x256xi1> to vector<1x256xi1>
    %191 = vector.broadcast %190 : vector<1x256xi1> to vector<8x256xi1>
    %192 = vector.broadcast %cst_129 : f32 to vector<8x256xf32>
    %193 = arith.select %191, %189, %192 : vector<8x256xi1>, vector<8x256xf32>
    %c8_130 = arith.constant 8 : index
    %c0_131 = arith.constant 0 : index
    %c0_132 = arith.constant 0 : index
    %194 = vector.load %arg3[%c8_130, %c0_131, %c0_132] : memref<9x8x8xf32, #tpu.memory_space<vmem>>, vector<1x8x8xf32>
    %195 = vector.shape_cast %194 : vector<1x8x8xf32> to vector<8x8xf32>
    %cst_133 = arith.constant dense<0.000000e+00> : vector<8x256xf32>
    %196 = tpu.matmul %195, %193, %cst_133 {dimension_numbers = #tpu.dot_dimension_numbers<[1], [0], [0], [1], [0, 0, 1, 1], [], []>} : vector<8x8xf32>, vector<8x256xf32>, vector<8x256xf32> -> vector<8x256xf32>
    %197 = arith.addf %188, %196 : vector<8x256xf32>
    %c0_134 = arith.constant 0 : index
    %c3_135 = arith.constant 3 : index
    %198 = vector.load %arg4[%c0_134, %c3_135] : memref<8x6xf32, #tpu.memory_space<vmem>>, vector<8x1xf32>
    %c0_136 = arith.constant 0 : index
    %c4_137 = arith.constant 4 : index
    %199 = vector.load %arg4[%c0_136, %c4_137] : memref<8x6xf32, #tpu.memory_space<vmem>>, vector<8x1xf32>
    %c0_138 = arith.constant 0 : index
    %c5_139 = arith.constant 5 : index
    %200 = vector.load %arg4[%c0_138, %c5_139] : memref<8x6xf32, #tpu.memory_space<vmem>>, vector<8x1xf32>
    %201 = vector.broadcast %198 : vector<8x1xf32> to vector<8x256xf32>
    %202 = arith.addf %197, %201 : vector<8x256xf32>
    %cst_140 = arith.constant dense<0.000000e+00> : vector<8xf32>
    %203 = vector.multi_reduction <add>, %202, %cst_140 [1] : vector<8x256xf32> to vector<8xf32>
    %204 = vector.shape_cast %203 : vector<8xf32> to vector<8x1xf32>
    %205 = arith.mulf %202, %202 : vector<8x256xf32>
    %cst_141 = arith.constant dense<0.000000e+00> : vector<8xf32>
    %206 = vector.multi_reduction <add>, %205, %cst_141 [1] : vector<8x256xf32> to vector<8xf32>
    %207 = vector.shape_cast %206 : vector<8xf32> to vector<8x1xf32>
    %cst_142 = arith.constant 3.906250e-03 : f32
    %208 = vector.broadcast %cst_142 : f32 to vector<8x1xf32>
    %209 = arith.mulf %204, %208 : vector<8x1xf32>
    %cst_143 = arith.constant 3.906250e-03 : f32
    %210 = vector.broadcast %cst_143 : f32 to vector<8x1xf32>
    %211 = arith.mulf %207, %210 : vector<8x1xf32>
    %212 = arith.mulf %209, %209 : vector<8x1xf32>
    %213 = arith.subf %211, %212 : vector<8x1xf32>
    %cst_144 = arith.constant 9.99999974E-6 : f32
    %214 = vector.broadcast %cst_144 : f32 to vector<8x1xf32>
    %215 = arith.addf %213, %214 : vector<8x1xf32>
    %216 = math.rsqrt %215 : vector<8x1xf32>
    %217 = arith.mulf %216, %199 : vector<8x1xf32>
    %218 = arith.mulf %209, %217 : vector<8x1xf32>
    %219 = arith.subf %200, %218 : vector<8x1xf32>
    %220 = vector.broadcast %217 : vector<8x1xf32> to vector<8x256xf32>
    %221 = arith.mulf %202, %220 : vector<8x256xf32>
    %222 = vector.broadcast %219 : vector<8x1xf32> to vector<8x256xf32>
    %223 = arith.addf %221, %222 : vector<8x256xf32>
    %cst_145 = arith.constant 0.000000e+00 : f32
    %224 = vector.broadcast %cst_145 : f32 to vector<8x256xf32>
    %225 = arith.cmpf oge, %223, %224 : vector<8x256xf32>
    %cst_146 = arith.constant 0.00999999977 : f32
    %226 = vector.broadcast %cst_146 : f32 to vector<8x256xf32>
    %227 = arith.mulf %226, %223 : vector<8x256xf32>
    %228 = arith.select %225, %223, %227 : vector<8x256xi1>, vector<8x256xf32>
    %c0_147 = arith.constant 0 : index
    %c0_148 = arith.constant 0 : index
    %c0_149 = arith.constant 0 : index
    %229 = vector.load %arg5[%c0_147, %c0_148, %c0_149] : memref<1x8x256xf32, #tpu.memory_space<vmem>>, vector<1x8x256xf32>
    %230 = vector.shape_cast %229 : vector<1x8x256xf32> to vector<8x256xf32>
    %231 = vector.shape_cast %228 : vector<8x256xf32> to vector<1x8x256xf32>
    tpu.vector_store %arg5[%c0_147, %c0_148, %c0_149], %231 {strides = array<i32>} : memref<1x8x256xf32, #tpu.memory_space<vmem>>, vector<1x8x256xf32>,
    return
  }
  func.func @transform_0(%arg0: i32) -> (i32, i32, i32) {
    %c0_i32 = arith.constant 0 : i32
    %c0_i32_0 = arith.constant 0 : i32
    %c0_i32_1 = arith.constant 0 : i32
    return %arg0, %c0_i32, %c0_i32_0 : i32, i32, i32
  }
  func.func @transform_1(%arg0: i32) -> (i32, i32, i32) {
    %c0_i32 = arith.constant 0 : i32
    %c0_i32_0 = arith.constant 0 : i32
    %c0_i32_1 = arith.constant 0 : i32
    %c0_i32_2 = arith.constant 0 : i32
    return %c0_i32, %c0_i32_0, %c0_i32_1 : i32, i32, i32
  }
  func.func @transform_2(%arg0: i32) -> (i32, i32, i32) {
    %c0_i32 = arith.constant 0 : i32
    %c0_i32_0 = arith.constant 0 : i32
    %c0_i32_1 = arith.constant 0 : i32
    %c0_i32_2 = arith.constant 0 : i32
    return %c0_i32, %c0_i32_0, %c0_i32_1 : i32, i32, i32
  }
  func.func @transform_3(%arg0: i32) -> (i32, i32) {
    %c0_i32 = arith.constant 0 : i32
    %c0_i32_0 = arith.constant 0 : i32
    %c0_i32_1 = arith.constant 0 : i32
    return %c0_i32, %c0_i32_0 : i32, i32
  }
  func.func @transform_4(%arg0: i32) -> (i32, i32, i32) {
    %c0_i32 = arith.constant 0 : i32
    %c0_i32_0 = arith.constant 0 : i32
    %c0_i32_1 = arith.constant 0 : i32
    return %arg0, %c0_i32, %c0_i32_0 : i32, i32, i32
  }
}

</mosaic_0001>

<bundles_post_ra>
// kernel: tpu_custom_call.1
= control target key start
LH: loop header
LB: loop body
LE: loop exit
PB: predicated region body
PF: predicated region fallthrough
CT: control target
= control target key end

     0   :  { %9 = vsyncpa [#allocation5], 0  ;;  %s2752_s0 = inlined_call_operand.vmem [shape: f32[2,4,256], index: 0, kind: input, shape index: {}]   ;;  %s2753_s1 = inlined_call_operand.vmem [shape: f32[9,8,4], index: 1, kind: input, shape index: {}]   ;;  %s2754_s2 = inlined_call_operand.vmem [shape: f32[9,8,8], index: 2, kind: input, shape index: {}]   ;;  %s2755_s3 = inlined_call_operand.vmem [shape: f32[8,6], index: 3, kind: input, shape index: {}]   ;;  %s2756_s4 = inlined_call_operand.hbm [shape: f32[2,8,256], index: 4, kind: output, shape index: {}]  }
   0x1   :  { %11 = vsyncpa [#allocation5 + $0x1], 0  ;;  %s2347_s15 = smov 0   ;;  %s2349_s16 = smov 0  }
   0x2   :  { %s2351_s17 = smov 0   ;;  %s2353_s18 = smov 0  }
   0x3 LB: > { %s2368_s19 = sadd.s32 4294967295, %s2304_s18   ;;  %s2100_s20 = sadd.s32 4294967294, %s2304_s18   ;;  %s2304_s18 = sphi %s2353_s18, %s2770_s18   ;;  %s2300_s17 = sphi %s2351_s17, %s2769_s17   ;;  %s2296_s16 = sphi %s2349_s16, %s2768_s16   ;;  %s2292_s15 = sphi %s2347_s15, %s2767_s15  }
   0x4   : > { %s2372_s21 = sadd.s32 1, %s2304_s18   ;;  %s113_s22 = sadd.s32 1, %s2300_s17 }
   0x5   : > { %s110_s23 = ssub.s32 %s2304_s18, %s2372_s21  ;;  %p123_p0 = scmp.ne.s32.totalorder %s2300_s17, %s2296_s16 }
   0x6   : > { %p111_p1 = scmp.eq.s32.totalorder %s110_s23, 0  ;;  %p124_p2 = scmp.eq.s32.totalorder %s2368_s19, 1 }
   0x7   : > { %p129_p3 = scmp.ne.s32.totalorder %s2296_s16, %s2292_s15  ;;  %p130_p4 = scmp.eq.s32.totalorder %s2100_s20, 1 }
   0x8   : > { %s2383_s24 = scalar_select %p111_p1, %s2300_s17, %s113_s22  }
   0x9   : > { %p2385_p5 = por %p124_p2, %p123_p0  ;;  %p2389_p6 = por %p130_p4, %p129_p3 }
   0xa   : > { %p2103_p7 = scmp.ge.s32.totalorder %s2304_s18, 1  ;;  %p165_p8 = scmp.lt.s32.totalorder %s2304_s18, 3 }
   0xc   : > { %p166_p9 = pnand %p2103_p7, %p165_p8 }
   0xd   : > { %p191_p10 = scmp.lt.s32.totalorder (!%p166_p9), %s2368_s19, 1  ;;  %s2307_s6 = smov (!%p166_p9), 17  }
   0xe   : > { %169 = sbr.rel (%p166_p9) target bundleno = 1588 (0x634), region = 36  ;;  %s2308_s7 = smov (!%p166_p9), 16  }
   0xf   : > { %s2309_s8 = smov (!%p166_p9), 15   ;;  %s2310_s9 = smov (!%p166_p9), 1  }
  0x10   : > { %s2311_s10 = smov (!%p166_p9), 127   ;;  %s2312_s11 = smov (!%p166_p9), 113  }
  0x11   : > { %s2313_s12 = smov (!%p166_p9), 112   ;;  %s2315_s13 = smov (!%p166_p9), 111  }
  0x13   : > { %v2306_v0 = vmov 0.0   ;;  %s192_s27 = scalar_select %p191_p10, %s2368_s19, 1  ;;  %v2314_v11 = vmov 0   ;;  %v2446_v13 = vld [vmem:[%s2755_s3] sm:$0xff]  ;;  %v196_v14 = vlaneseq  ;;  %vm246_vm0 = vcmask 138240   ;;  %v2107_v33 = vld [vmem:[%s2753_s1 + $0x8] sm:$0xff] }
  0x14   : > { %228 = vst [vmem:[#allocation2] sm:$0xf] %v2306_v0  ;;  %229 = vst [vmem:[#allocation2 + $0xc] sm:$0xf] %v2306_v0  ;;  %338 = vmatprep.mubr.f32.mxu0 %v2306_v0  ;;  %418 = vmatprep.mubr.f32.mxu1 %v2306_v0  ;;  %vm262_vm1 = vcmask 130048   ;;  %vm269_vm2 = vcmask 1043456  }
  0x15   : > { %s2176_s28 = sshll.u32 %s192_s27, 3  ;;  %2232 = vset.pattern.permute.xlu0 %v2314_v11  ;;  %v197_v15 = vand.u32 127, %v196_v14  ;;  %vm265_vm5 = vcmask 31744   ;;  %vm440_vm6 = vcmask 121856   ;;  %v253_v36 = vld [vmem:[%s2753_s1] sm:$0xff]  ;;  %vm542_vm9 = vcmask 7168  }
  0x16   : > { %s195_s5 = scalar_lea.vmem %s2752_s0, %s2176_s28  ;;  %v2114_v45 = vld [vmem:[%s2753_s1 + $0x10] sm:$0xff]  ;;  %vm729_vm10 = vcmask 1039360   ;;  %v2118_v52 = vld [vmem:[%s2753_s1 + $0x18] sm:$0xff]  ;;  %v2122_v53 = vld [vmem:[%s2753_s1 + $0x20] sm:$0xff]  ;;  %vm831_vm11 = vcmask 924672   ;;  %vm935_vm12 = vcmask 916480  }
  0x17   : > { %v2404_v1 = vld [vmem:[%s195_s5] sm:$0xff]  ;;  %v198_v18 = vadd.s32 128, %v197_v15  ;;  %v203_v22 = vand.u32 15, %v197_v15  ;;  %v2126_v61 = vld [vmem:[%s2753_s1 + $0x28] sm:$0xff]  ;;  %vm1029_vm13 = vcmask 908288   ;;  %v2161_v25 = vld [vmem:[%s2754_s2 + $0x30] sm:$0xff] }
  0x18   : > { %230 = vst [vmem:[#allocation2 + $0x4] sm:$0xff] %v2404_v1  ;;  %v2421_v7 = vcombine.high %v2404_v1, %v2404_v1  ;;  %s2321_s28 = smov [#allocation4]  }
  0x19   : > { %v210_v21 = vand.u32 15, %v198_v18  ;;  %vm2453_vm4 = vcmp.ge.s32.totalorder %v203_v22, 1  ;;  %vm2474_vm7 = vcmp.lt.s32.totalorder %v203_v22, 15  ;;  %s2248_s29 = sshll.u32 %s2321_s28, 4  ;;  %s2249_s29 = int_to_ptr.vmem [resolvable:$false] %s2248_s29 }
  0x1a   : > { %s2250_s30 = scalar_lea.vmem %s2249_s29, 512 }
  0x1b   : > { %v719_v8 = vld [vmem:[#allocation2 + $0xc] sm:$0xf]  ;;  %vm2449_vm3 = vcmp.ge.s32.totalorder %v210_v21, 1  ;;  %vm2478_vm8 = vcmp.lt.s32.totalorder %v210_v21, 15  ;;  %v2138_v21 = vld [vmem:[%s2753_s1 + $0x40] sm:$0xff] }
  0x1c   : > { %v821_v9 = vld [vmem:[#allocation2 + $0xc] sm:$0xf] }
  0x1d   : > { %v923_v10 = vld [vmem:[#allocation2 + $0xc] sm:$0xf] }
  0x1e   : > { %v1019_v12 = vld [vmem:[#allocation2 + $0xc] sm:$0xf] }
  0x1f   : > { %v232_v2 = vld [vmem:[#allocation2 + $0x8] sm:$0xf]  ;;  %v231_v3 = vld [vmem:[#allocation2] sm:$0xff] }
  0x20   : > { %244 = vrot.lane.b32.xlu1 %v232_v2, %s2307_s6  ;;  %260 = vrot.lane.b32.xlu0 %v232_v2, %s2308_s7  ;;  %v426_v4 = vld [vmem:[#allocation2 + $0x8] sm:$0xf]  ;;  %v433_v5 = vcombine.high %v231_v3, %v231_v3 }
  0x21   : > { %v532_v6 = vld [vmem:[#allocation2 + $0x8] sm:$0xf] }
  0x24   : > { %240 = vrot.lane.b32.xlu1 %v231_v3, %s2307_s6  ;;  %256 = vrot.lane.b32.xlu0 %v231_v3, %s2308_s7 }
  0x28   : > { %438 = vrot.lane.b32.xlu1 %v426_v4, %s2309_s8  ;;  %434 = vrot.lane.b32.xlu0 %v231_v3, %s2309_s8 }
  0x2c   : > { %242 = vrot.lane.b32.xlu1 %v433_v5, %s2307_s6  ;;  %258 = vrot.lane.b32.xlu0 %v433_v5, %s2308_s7 }
  0x30   : > { %538 = vrot.lane.b32.xlu1 %v433_v5, %s2310_s9  ;;  %436 = vrot.lane.b32.xlu0 %v433_v5, %s2309_s8 }
  0x34   : > { %536 = vrot.lane.b32.xlu1 %v231_v3, %s2310_s9  ;;  %540 = vrot.lane.b32.xlu0 %v532_v6, %s2310_s9  ;;  %v2130_v6 = vld [vmem:[%s2753_s1 + $0x30] sm:$0xff] }
  0x38   : > { %727 = vrot.lane.b32.xlu1 %v719_v8, %s2311_s10  ;;  %725 = vrot.lane.b32.xlu0 %v2421_v7, %s2311_s10 }
  0x3c   : > { %827 = vrot.lane.b32.xlu1 %v2421_v7, %s2312_s11  ;;  %723 = vrot.lane.b32.xlu0 %v2404_v1, %s2311_s10 }
  0x40   : > { %825 = vrot.lane.b32.xlu1 %v2404_v1, %s2312_s11  ;;  %829 = vrot.lane.b32.xlu0 %v821_v9, %s2312_s11 }
  0x44   : > { %933 = vrot.lane.b32.xlu1 %v923_v10, %s2313_s12  ;;  %931 = vrot.lane.b32.xlu0 %v2421_v7, %s2313_s12 }
  0x48   : > { %1025 = vrot.lane.b32.xlu1 %v2421_v7, %s2315_s13  ;;  %929 = vrot.lane.b32.xlu0 %v2404_v1, %s2313_s12 }
  0x4c   : > { %1023 = vrot.lane.b32.xlu1 %v2404_v1, %s2315_s13  ;;  %1027 = vrot.lane.b32.xlu0 %v1019_v12, %s2315_s13  ;;  %v2134_v12 = vld [vmem:[%s2753_s1 + $0x38] sm:$0xff] }
  0x50   : > { %1123 = vperm.xlu0 %2232, %v2446_v13  }
  0x92   : > { %v245_v16 = vpop.permute.xlu1 %244  ;;  %v261_v17 = vpop.permute.xlu0 %260 }
  0x96   : > { %v241_v19 = vpop.permute.xlu1 %240  ;;  %v257_v20 = vpop.permute.xlu0 %256 }
  0x9a   : > { %v439_v23 = vpop.permute.xlu1 %438  ;;  %v435_v24 = vpop.permute.xlu0 %434 }
  0x9e   : > { %v243_v27 = vpop.permute.xlu1 %242  ;;  %v259_v28 = vpop.permute.xlu0 %258 }
  0x9f   : > { %v247_v29 = vsel %vm246_vm0, %v241_v19, %v243_v27  ;;  %v264_v30 = vsel %vm262_vm1, %v259_v28, %v261_v17  ;;  %v263_v31 = vsel %vm262_vm1, %v257_v20, %v259_v28  ;;  %v248_v32 = vsel %vm246_vm0, %v243_v27, %v245_v16 }
  0xa0   : > { %2108 = vmatprep.subr.msk.mxu0 %vm269_vm2, %v264_v30  ;;  %v252_v34 = vsel %vm2449_vm3, %v248_v32, 0.0  ;;  %v251_v35 = vsel %vm2453_vm4, %v247_v29, 0.0 }
  0xa1   : > { %2109 = vmatpush1.msk.msra.mxu0 %vm269_vm2, %v263_v31  ;;  %2111 = vmatprep.subr.msk.mxu1 %vm269_vm2, %v252_v34 }
  0xa2   : > { %2112 = vmatpush1.msk.msra.mxu1 %vm269_vm2, %v251_v35  ;;  %v539_v39 = vpop.permute.xlu1 %538  ;;  %v437_v40 = vpop.permute.xlu0 %436  ;;  %2110 = vmatmul.mubr.msk.f32.vlgmr.msra.gmra.mxu0 %vm265_vm5, %v2107_v33 }
  0xa3   : > { %v441_v41 = vsel %vm440_vm6, %v435_v24, %v437_v40  ;;  %v442_v42 = vsel %vm440_vm6, %v437_v40, %v439_v23  ;;  %2113 = vmatmul.mubr.msk.f32.vlgmr.msra.gmra.mxu1 %vm265_vm5, %v253_v36  ;;  %522 = vmatprep.mubr.f32.mxu0 %v2306_v0 }
  0xa4   : > { %v445_v43 = vsel %vm2474_vm7, %v441_v41, 0.0  ;;  %v446_v44 = vsel %vm2478_vm8, %v442_v42, 0.0  ;;  %624 = vmatprep.mubr.f32.mxu1 %v2306_v0 }
  0xa5   : > { %2115 = vmatprep.subr.msk.mxu0 %vm269_vm2, %v446_v44 }
  0xa6   : > { %v537_v46 = vpop.permute.xlu1 %536  ;;  %2116 = vmatpush1.msk.msra.mxu0 %vm269_vm2, %v445_v43  ;;  %v541_v47 = vpop.permute.xlu0 %540 }
  0xa7   : > { %v543_v48 = vsel %vm542_vm9, %v537_v46, %v539_v39  ;;  %v544_v49 = vsel %vm542_vm9, %v539_v39, %v541_v47  ;;  %2117 = vmatmul.mubr.msk.f32.vlgmr.msra.gmra.mxu0 %vm265_vm5, %v2114_v45  ;;  %2123 = vmatprep.subr.msk.mxu0 %vm269_vm2, %v2421_v7 }
  0xa8   : > { %v547_v50 = vsel %vm2453_vm4, %v543_v48, 0.0  ;;  %v548_v51 = vsel %vm2449_vm3, %v544_v49, 0.0  ;;  %2124 = vmatpush1.msk.msra.mxu0 %vm269_vm2, %v2404_v1  ;;  %709 = vmatprep.mubr.f32.mxu0 %v2306_v0 }
  0xa9   : > { %2119 = vmatprep.subr.msk.mxu1 %vm269_vm2, %v548_v51 }
  0xaa   : > { %v728_v54 = vpop.permute.xlu1 %727  ;;  %2120 = vmatpush1.msk.msra.mxu1 %vm269_vm2, %v547_v50  ;;  %v726_v55 = vpop.permute.xlu0 %725 }
  0xab   : > { %v731_v56 = vsel %vm729_vm10, %v726_v55, %v728_v54  ;;  %2121 = vmatmul.mubr.msk.f32.vlgmr.msra.gmra.mxu1 %vm265_vm5, %v2118_v52  ;;  %2125 = vmatmul.mubr.msk.f32.vlgmr.msra.gmra.mxu0 %vm265_vm5, %v2122_v53 }
  0xac   : > { %v735_v57 = vsel %vm2478_vm8, %v731_v56, 0.0  ;;  %811 = vmatprep.mubr.f32.mxu1 %v2306_v0  ;;  %913 = vmatprep.mubr.f32.mxu0 %v2306_v0 }
  0xad   : > { %2127 = vmatprep.subr.msk.mxu1 %vm269_vm2, %v735_v57 }
  0xae   : > { %v828_v58 = vpop.permute.xlu1 %827  ;;  %v724_v59 = vpop.permute.xlu0 %723 }
  0xaf   : > { %v730_v60 = vsel %vm729_vm10, %v724_v59, %v726_v55 }
  0xb0   : > { %v734_v62 = vsel %vm2474_vm7, %v730_v60, 0.0 }
  0xb1   : > { %2128 = vmatpush1.msk.msra.mxu1 %vm269_vm2, %v734_v62 }
  0xb2   : > { %v826_v63 = vpop.permute.xlu1 %825  ;;  %v830_v1 = vpop.permute.xlu0 %829  ;;  %2129 = vmatmul.mubr.msk.f32.vlgmr.msra.gmra.mxu1 %vm265_vm5, %v2126_v61 }
  0xb3   : > { %v832_v2 = vsel %vm831_vm11, %v826_v63, %v828_v58  ;;  %v833_v3 = vsel %vm831_vm11, %v828_v58, %v830_v1  ;;  %1009 = vmatprep.mubr.f32.mxu1 %v2306_v0 }
  0xb4   : > { %v836_v4 = vsel %vm2453_vm4, %v832_v2, 0.0  ;;  %v837_v5 = vsel %vm2449_vm3, %v833_v3, 0.0 }
  0xb5   : > { %2131 = vmatprep.subr.msk.mxu0 %vm269_vm2, %v837_v5 }
  0xb6   : > { %v934_v7 = vpop.permute.xlu1 %933  ;;  %2132 = vmatpush1.msk.msra.mxu0 %vm269_vm2, %v836_v4  ;;  %v932_v8 = vpop.permute.xlu0 %931  ;;  %v2316_v4 = vmov 1  }
  0xb7   : > { %v937_v9 = vsel %vm935_vm12, %v932_v8, %v934_v7  ;;  %2133 = vmatmul.mubr.msk.f32.vlgmr.msra.gmra.mxu0 %vm265_vm5, %v2130_v6  ;;  %2233 = vset.pattern.permute.xlu0 %v2316_v4 }
  0xb8   : > { %2135 = vmatprep.subr.msk.mxu1 %vm269_vm2, %v937_v9  ;;  %1111 = vmatprep.mubr.f32.mxu0 %v2306_v0 }
  0xba   : > { %v1026_v10 = vpop.permute.xlu1 %1025  ;;  %v930_v11 = vpop.permute.xlu0 %929 }
  0xbb   : > { %v936_v14 = vsel %vm935_vm12, %v930_v11, %v932_v8 }
  0xbc   : > { %2136 = vmatpush1.msk.msra.mxu1 %vm269_vm2, %v936_v14 }
  0xbd   : > { %2137 = vmatmul.mubr.msk.f32.vlgmr.msra.gmra.mxu1 %vm265_vm5, %v2134_v12  ;;  %v2317_v12 = vmov 2  }
  0xbe   : > { %v1024_v15 = vpop.permute.xlu1 %1023  ;;  %v1028_v16 = vpop.permute.xlu0 %1027  ;;  %1272 = vmatprep.mubr.f32.mxu1 %v2306_v0  ;;  %2234 = vset.pattern.permute.xlu1 %v2317_v12 }
  0xbf   : > { %v1030_v17 = vsel %vm1029_vm13, %v1024_v15, %v1026_v10  ;;  %v1031_v18 = vsel %vm1029_vm13, %v1026_v10, %v1028_v16 }
  0xc0   : > { %v1034_v19 = vsel %vm2474_vm7, %v1030_v17, 0.0  ;;  %v1035_v20 = vsel %vm2478_vm8, %v1031_v18, 0.0 }
  0xc1   : > { %2139 = vmatprep.subr.msk.mxu0 %vm269_vm2, %v1035_v20 }
  0xc2   : > { %2140 = vmatpush1.msk.msra.mxu0 %vm269_vm2, %v1034_v19  ;;  %vm1204_vm2 = vcmask 64512  }
  0xc3   : > { %2141 = vmatmul.mubr.msk.f32.vlgmr.msra.gmra.mxu0 %vm265_vm5, %v2138_v21 }
  0xc4   : > { %1346 = vmatprep.mubr.f32.mxu0 %v2306_v0 }
  0xcb   : > { %v1124_v56 = vpop.permute.xlu0 %1123 }
 0x162   : > { %v340_v22 = vpop.f32.mrf.mxu0 }
 0x163   : > { %v420_v24 = vpop.f32.mrf.mxu1 }
 0x164   : > { %v342_v23 = vpop.f32.mrf.mxu0  ;;  %v421_v29 = vadd.f32 %v420_v24, %v340_v22 }
 0x165   : > { %v422_v27 = vpop.f32.mrf.mxu1 }
 0x166   : > { %v423_v30 = vadd.f32 %v422_v27, %v342_v23 }
 0x167   : > { %v524_v28 = vpop.f32.mrf.mxu0 }
 0x168   : > { %v529_v33 = vadd.f32 %v524_v28, %v421_v29 }
 0x169   : > { %v526_v31 = vpop.f32.mrf.mxu0 }
 0x16a   : > { %v530_v34 = vadd.f32 %v526_v31, %v423_v30  ;;  %v2318_v31 = vmov 3  }
 0x16b   : > { %v626_v32 = vpop.f32.mrf.mxu1  ;;  %v711_v36 = vpop.f32.mrf.mxu0 }
 0x16c   : > { %v631_v39 = vadd.f32 %v626_v32, %v529_v33 }
 0x16d   : > { %v628_v35 = vpop.f32.mrf.mxu1  ;;  %v713_v41 = vpop.f32.mrf.mxu0 }
 0x16e   : > { %v632_v40 = vadd.f32 %v628_v35, %v530_v34  ;;  %v716_v43 = vadd.f32 %v711_v36, %v631_v39 }
 0x170   : > { %v717_v44 = vadd.f32 %v713_v41, %v632_v40 }
 0x172   : > { %v813_v42 = vpop.f32.mrf.mxu1 }
 0x173   : > { %v818_v47 = vadd.f32 %v813_v42, %v716_v43 }
 0x174   : > { %v815_v45 = vpop.f32.mrf.mxu1 }
 0x175   : > { %v819_v48 = vadd.f32 %v815_v45, %v717_v44  ;;  %v2142_v45 = vld [vmem:[%s2754_s2 + $0x8] sm:$0xff] }
 0x177   : > { %v915_v46 = vpop.f32.mrf.mxu0 }
 0x178   : > { %v920_v51 = vadd.f32 %v915_v46, %v818_v47 }
 0x179   : > { %v917_v49 = vpop.f32.mrf.mxu0 }
 0x17a   : > { %v921_v52 = vadd.f32 %v917_v49, %v819_v48 }
 0x17d   : > { %v1011_v50 = vpop.f32.mrf.mxu1 }
 0x17e   : > { %v1016_v54 = vadd.f32 %v1011_v50, %v920_v51  ;;  %v1191_v51 = vld [vmem:[%s2754_s2] sm:$0xff] }
 0x17f   : > { %v1013_v53 = vpop.f32.mrf.mxu1 }
 0x180   : > { %v1017_v57 = vadd.f32 %v1013_v53, %v921_v52 }
 0x183   : > { %v1113_v55 = vpop.f32.mrf.mxu0 }
 0x184   : > { %v1118_v58 = vadd.f32 %v1113_v55, %v1016_v54 }
 0x185   : > { %v1115_v59 = vpop.f32.mrf.mxu0 }
 0x186   : > { %v1119_v60 = vadd.f32 %v1115_v59, %v1017_v57  ;;  %v1126_v61 = vadd.f32 %v1124_v56, %v1118_v58  ;;  %v2147_v57 = vld [vmem:[%s2754_s2 + $0x10] sm:$0xff] }
 0x188   : > { %v1127_v62 = vadd.f32 %v1124_v56, %v1119_v60  ;;  %v1131_v1 = vmul.f32 %v1126_v61, %v1126_v61 }
 0x18a   : > { %v1128_v63 = vadd.f32 %v1127_v62, %v1126_v61  ;;  %v1132_v2 = vmul.f32 %v1127_v62, %v1127_v62 }
 0x18c   : > { %1129 = vadd.xlane.f32.xlu1 %v1128_v63  ;;  %v1133_v3 = vadd.f32 %v1132_v2, %v1131_v1  ;;  %v2151_v63 = vld [vmem:[%s2754_s2 + $0x18] sm:$0xff] }
 0x18e   : > { %1134 = vadd.xlane.f32.xlu0 %v1133_v3 }
 0x215   : > { %v1130_v5 = vpop.xlane.xlu1 %1129 }
 0x216   : > { %v1136_v6 = vmul.f32 0.00390625, %v1130_v5 }
 0x217   : > { %v1135_v7 = vpop.xlane.xlu0 %1134 }
 0x218   : > { %v1138_v8 = vmul.f32 %v1136_v6, %v1136_v6  ;;  %v1137_v9 = vmul.f32 0.00390625, %v1135_v7 }
 0x21a   : > { %v1139_v10 = vsub.f32 %v1137_v9, %v1138_v8 }
 0x21c   : > { %v1140_v11 = vadd.f32 1e-05, %v1139_v10 }
 0x21e   : > { %2240 = vrsqrt.f32 %v1140_v11  ;;  %v2165_v11 = vld [vmem:[%s2754_s2 + $0x38] sm:$0xff] }
 0x22b   : > { %v2241_v14 = vpop.eup %2240 }
 0x22c   : > { %v1142_v15 = vmul.f32 %v2241_v14, %v2446_v13 }
 0x22e   : > { %1151 = vperm.xlu0 %2233, %v1142_v15   ;;  %v1143_v16 = vmul.f32 %v1142_v15, %v1136_v6  ;;  %v2157_v6 = vld [vmem:[%s2754_s2 + $0x28] sm:$0xff] }
 0x230   : > { %1145 = vrot.lane.b32.xlu1 %v1143_v16, %s2310_s9 }
 0x232   : > { %1443 = vrot.lane.b32.xlu0 %v2306_v0, %s2310_s9 }
 0x236   : > { %1621 = vrot.lane.b32.xlu0 %v2306_v0, %s2311_s10 }
 0x23a   : > { %1803 = vrot.lane.b32.xlu0 %v2306_v0, %s2313_s12 }
 0x2a2   : > { %v1146_v17 = vpop.permute.xlu1 %1145 }
 0x2a3   : > { %v1148_v18 = vsub.f32 %v2446_v13, %v1146_v17 }
 0x2a5   : > { %1158 = vperm.xlu1 %2234, %v1148_v18  }
 0x2a9   : > { %1194 = vrot.lane.b32.xlu1 %v2306_v0, %s2308_s7  ;;  %v1152_v19 = vpop.permute.xlu0 %1151 }
 0x2aa   : > { %v1154_v20 = vmul.f32 %v1152_v19, %v1126_v61  ;;  %v1155_v21 = vmul.f32 %v1152_v19, %v1127_v62  ;;  %2235 = vset.pattern.permute.xlu1 %v2318_v31  ;;  %v2155_v62 = vld [vmem:[%s2754_s2 + $0x20] sm:$0xff] }
 0x2ad   : > { %1179 = vrot.lane.b32.xlu1 %v2306_v0, %s2307_s6  ;;  %v1444_v34 = vpop.permute.xlu0 %1443 }
 0x2b1   : > { %1353 = vrot.lane.b32.xlu1 %v2306_v0, %s2309_s8  ;;  %v1622_v36 = vpop.permute.xlu0 %1621 }
 0x2b5   : > { %1711 = vrot.lane.b32.xlu1 %v2306_v0, %s2312_s11  ;;  %v2616_v40 = vpop.permute.xlu0 %1803 }
 0x320   : > { %v1159_v22 = vpop.permute.xlu1 %1158 }
 0x321   : > { %v1161_v23 = vadd.f32 %v1159_v22, %v1154_v20  ;;  %v1162_v24 = vadd.f32 %v1159_v22, %v1155_v21 }
 0x323   : > { %vm1163_vm14 = vcmp.ge.f32.partialorder %v1161_v23, 0.0  ;;  %vm1164_vm15 = vcmp.ge.f32.partialorder %v1162_v24, 0.0  ;;  %v1165_v27 = vmul.f32 0.01, %v1161_v23  ;;  %v1166_v28 = vmul.f32 0.01, %v1162_v24 }
 0x324   : > { %v1195_v32 = vpop.permute.xlu1 %1194 }
 0x325   : > { %v2587_v29 = vsel %vm1163_vm14, %v1161_v23, %v1165_v27  ;;  %v1168_v30 = vsel %vm1164_vm15, %v1162_v24, %v1166_v28 }
 0x326   : > { %1357 = vrot.lane.b32.xlu0 %v1168_v30, %s2309_s8  ;;  %1196 = vrot.lane.b32.xlu1 %v2587_v29, %s2308_s7 }
 0x328   : > { %v1180_v33 = vpop.permute.xlu1 %1179 }
 0x32a   : > { %1445 = vrot.lane.b32.xlu0 %v2587_v29, %s2310_s9  ;;  %1198 = vrot.lane.b32.xlu1 %v1168_v30, %s2308_s7 }
 0x32c   : > { %v1354_v35 = vpop.permute.xlu1 %1353 }
 0x32e   : > { %1709 = vrot.lane.b32.xlu0 %v1168_v30, %s2312_s11  ;;  %1181 = vrot.lane.b32.xlu1 %v2587_v29, %s2307_s6 }
 0x330   : > { %v1712_v39 = vpop.permute.xlu1 %1711 }
 0x332   : > { %1707 = vrot.lane.b32.xlu0 %v2587_v29, %s2312_s11  ;;  %1183 = vrot.lane.b32.xlu1 %v1168_v30, %s2307_s6  ;;  %s2177_s11 = sshll.u32 %s2368_s19, 8 }
 0x333   : > { %s2711_s23 = scalar_lea.hbm %s2756_s4, %s2177_s11 }
 0x336   : > { %1887 = vrot.lane.b32.xlu0 %v1168_v30, %s2315_s13  ;;  %1355 = vrot.lane.b32.xlu1 %v2587_v29, %s2309_s8  ;;  %s188_s8 = sand.u32 1, %s2296_s16  }
 0x337   : > { %s2027_s19 = scalar_lea.sflag [#allocation5], %s188_s8 }
 0x33a   : > { %1885 = vrot.lane.b32.xlu0 %v2587_v29, %s2315_s13  ;;  %1447 = vrot.lane.b32.xlu1 %v1168_v30, %s2310_s9 }
 0x33e   : > { %1619 = vrot.lane.b32.xlu1 %v1168_v30, %s2311_s10 }
 0x342   : > { %1617 = vrot.lane.b32.xlu1 %v2587_v29, %s2311_s10  ;;  %s2104_s10 = sshll.u32 %s188_s8, 4 }
 0x346   : > { %1801 = vrot.lane.b32.xlu1 %v1168_v30, %s2313_s12 }
 0x34a   : > { %1799 = vrot.lane.b32.xlu1 %v2587_v29, %s2313_s12  ;;  %s190_s12 = scalar_lea.vmem [#allocation4], %s2104_s10 }
 0x34e   : > { %1889 = vrot.lane.b32.xlu1 %v2306_v0, %s2315_s13  ;;  %s2041_s13 = sshll.u32 %s190_s12, 4  ;;  %s2713_s13 = int_to_ptr.vmem [resolvable:$true] %s2041_s13 }
 0x34f   : > { %s2244_s27 = scalar_lea.vmem %s2713_s13, 256  ;;  %p2251_p0 = scmp.lt.s32.totalorder %s2713_s13, %s2249_s29 }
 0x350   : > { %p2245_p11 = scmp.ne.s32.totalorder %s2713_s13, %s2244_s27  ;;  %p2252_p1 = scmp.lt.s32.totalorder %s2250_s30, %s2244_s27 }
 0x352   : > { %1978 = vperm.xlu1 %2235, %v2446_v13   ;;  %p2246_p12 = pnand %p2245_p11, %p2385_p5  ;;  %p2253_p2 = por %p2252_p1, %p2251_p0 }
 0x354   : > { %p2247_p13 = pneg %p2246_p12 }
 0x356   : > { %p2254_p3 = pnand %p2253_p2, %p2247_p13 }
 0x398   : > { %v1197_v41 = vpop.permute.xlu1 %1196  ;;  %v1358_v42 = vpop.permute.xlu0 %1357 }
 0x399   : > { %v1200_v46 = vsel %vm262_vm1, %v1195_v32, %v1197_v41 }
 0x39c   : > { %v1199_v43 = vpop.permute.xlu1 %1198  ;;  %v1446_v48 = vpop.permute.xlu0 %1445 }
 0x39d   : > { %v1201_v44 = vsel %vm262_vm1, %v1197_v41, %v1199_v43  ;;  %v1449_v1 = vsel %vm542_vm9, %v1444_v34, %v1446_v48 }
 0x39e   : > { %1238 = vmatprep.subr.mxu1 %v1201_v44 }
 0x39f   : > { %1239 = vmatpush1.msra.mxu1 %v1200_v46 }
 0x3a0   : > { %v1182_v47 = vpop.permute.xlu1 %1181  ;;  %2143 = vmatmul.mubr.msk.f32.vlgmr.msra.gmra.mxu1 %vm1204_vm2, %v2142_v45  ;;  %v1710_v53 = vpop.permute.xlu0 %1709 }
 0x3a1   : > { %1434 = vmatprep.mubr.f32.mxu1 %v2306_v0  ;;  %v1185_v52 = vsel %vm246_vm0, %v1180_v33, %v1182_v47  ;;  %v1714_v59 = vsel %vm831_vm11, %v1710_v53, %v1712_v39 }
 0x3a4   : > { %v1184_v49 = vpop.permute.xlu1 %1183  ;;  %v1708_v60 = vpop.permute.xlu0 %1707 }
 0x3a5   : > { %v1186_v50 = vsel %vm246_vm0, %v1182_v47, %v1184_v49  ;;  %v1713_v2 = vsel %vm831_vm11, %v1708_v60, %v1710_v53 }
 0x3a6   : > { %2144 = vmatprep.subr.msk.mxu0 %vm2449_vm3, %v1186_v50 }
 0x3a7   : > { %2145 = vmatpush1.msk.msra.mxu0 %vm2453_vm4, %v1185_v52 }
 0x3a8   : > { %v1356_v54 = vpop.permute.xlu1 %1355  ;;  %2146 = vmatmul.mubr.msk.f32.vlgmr.msra.gmra.mxu0 %vm1204_vm2, %v1191_v51  ;;  %v1888_v8 = vpop.permute.xlu0 %1887 }
 0x3a9   : > { %v1359_v55 = vsel %vm440_vm6, %v1354_v35, %v1356_v54  ;;  %v1360_v56 = vsel %vm440_vm6, %v1356_v54, %v1358_v42  ;;  %1524 = vmatprep.mubr.f32.mxu0 %v2306_v0 }
 0x3aa   : > { %2148 = vmatprep.subr.msk.mxu1 %vm2478_vm8, %v1360_v56 }
 0x3ab   : > { %2149 = vmatpush1.msk.msra.mxu1 %vm2474_vm7, %v1359_v55 }
 0x3ac   : > { %2150 = vmatmul.mubr.msk.f32.vlgmr.msra.gmra.mxu1 %vm1204_vm2, %v2147_v57  ;;  %1568 = vmatprep.subr.mxu1 %v1168_v30  ;;  %v1448_v58 = vpop.permute.xlu1 %1447  ;;  %v1886_v14 = vpop.permute.xlu0 %1885 }
 0x3ad   : > { %v1450_v61 = vsel %vm542_vm9, %v1446_v48, %v1448_v58  ;;  %1569 = vmatpush1.msra.mxu1 %v2587_v29  ;;  %1602 = vmatprep.mubr.f32.mxu1 %v2306_v0  ;;  %v1891_v17 = vsel %vm1029_vm13, %v1886_v14, %v1888_v8 }
 0x3ae   : > { %2152 = vmatprep.subr.msk.mxu0 %vm2449_vm3, %v1450_v61  ;;  %2162 = vmatprep.subr.msk.mxu1 %vm2449_vm3, %v1714_v59  ;;  %v2319_v61 = vmov 4  }
 0x3af   : > { %2153 = vmatpush1.msk.msra.mxu0 %vm2453_vm4, %v1449_v1  ;;  %2236 = vset.pattern.permute.xlu1 %v2319_v61 }
 0x3b0   : > { %2156 = vmatmul.mubr.msk.f32.vlgmr.msra.gmra.mxu1 %vm1204_vm2, %v2155_v62  ;;  %v1620_v3 = vpop.permute.xlu1 %1619  ;;  %2154 = vmatmul.mubr.msk.f32.vlgmr.msra.gmra.mxu0 %vm1204_vm2, %v2151_v63 }
 0x3b1   : > { %2163 = vmatpush1.msk.msra.mxu1 %vm2453_vm4, %v1713_v2  ;;  %v1624_v4 = vsel %vm729_vm10, %v1620_v3, %v1622_v36  ;;  %1698 = vmatprep.mubr.f32.mxu0 %v2306_v0 }
 0x3b2   : > { %2158 = vmatprep.subr.msk.mxu0 %vm2478_vm8, %v1624_v4  ;;  %1788 = vmatprep.mubr.f32.mxu1 %v2306_v0 }
 0x3b4   : > { %v1618_v5 = vpop.permute.xlu1 %1617  ;;  %2164 = vmatmul.mubr.msk.f32.vlgmr.msra.gmra.mxu1 %vm1204_vm2, %v2161_v25 }
 0x3b5   : > { %v1623_v26 = vsel %vm729_vm10, %v1618_v5, %v1620_v3  ;;  %1966 = vmatprep.mubr.f32.mxu1 %v2306_v0  ;;  %v2320_v5 = vmov 5  }
 0x3b6   : > { %2159 = vmatpush1.msk.msra.mxu0 %vm2474_vm7, %v1623_v26  ;;  %2237 = vset.pattern.permute.xlu0 %v2320_v5 }
 0x3b7   : > { %2160 = vmatmul.mubr.msk.f32.vlgmr.msra.gmra.mxu0 %vm1204_vm2, %v2157_v6 }
 0x3b8   : > { %v1802_v7 = vpop.permute.xlu1 %1801  ;;  %1876 = vmatprep.mubr.f32.mxu0 %v2306_v0  ;;  %v2167_v0 = vld [vmem:[%s2754_s2 + $0x40] sm:$0xff] }
 0x3b9   : > { %v1806_v9 = vsel %vm935_vm12, %v1802_v7, %v2616_v40 }
 0x3ba   : > { %1842 = vmatprep.subr.mxu0 %v1806_v9 }
 0x3bc   : > { %v1800_v10 = vpop.permute.xlu1 %1799 }
 0x3bd   : > { %v1805_v12 = vsel %vm935_vm12, %v1800_v10, %v1802_v7 }
 0x3be   : > { %1843 = vmatpush1.msra.mxu0 %v1805_v12 }
 0x3bf   : > { %2166 = vmatmul.mubr.msk.f32.vlgmr.msra.gmra.mxu0 %vm1204_vm2, %v2165_v11 }
 0x3c0   : > { %v1890_v15 = vpop.permute.xlu1 %1889 }
 0x3c1   : > { %v1892_v16 = vsel %vm1029_vm13, %v1888_v8, %v1890_v15 }
 0x3c2   : > { %2168 = vmatprep.subr.msk.mxu1 %vm2478_vm8, %v1892_v16 }
 0x3c3   : > { %2169 = vmatpush1.msk.msra.mxu1 %vm2474_vm7, %v1891_v17 }
 0x3c4   : > { %2170 = vmatmul.mubr.msk.f32.vlgmr.msra.gmra.mxu1 %vm1204_vm2, %v2167_v0 }
 0x3cd   : > { %v1979_v50 = vpop.permute.xlu1 %1978 }
 0x460   : > { %v1274_v18 = vpop.f32.mrf.mxu1 }
 0x462   : > { %v1276_v19 = vpop.f32.mrf.mxu1 }
 0x468   : > { %v1348_v20 = vpop.f32.mrf.mxu0 }
 0x469   : > { %v1349_v22 = vadd.f32 %v1348_v20, %v1274_v18 }
 0x46a   : > { %v1350_v21 = vpop.f32.mrf.mxu0 }
 0x46b   : > { %v1351_v24 = vadd.f32 %v1350_v21, %v1276_v19 }
 0x46c   : > { %v1436_v23 = vpop.f32.mrf.mxu1 }
 0x46d   : > { %v1441_v28 = vadd.f32 %v1436_v23, %v1349_v22 }
 0x46e   : > { %v1438_v27 = vpop.f32.mrf.mxu1 }
 0x46f   : > { %v1442_v30 = vadd.f32 %v1438_v27, %v1351_v24 }
 0x470   : > { %v1526_v29 = vpop.f32.mrf.mxu0  ;;  %v1604_v32 = vpop.f32.mrf.mxu1 }
 0x471   : > { %v1531_v38 = vadd.f32 %v1526_v29, %v1441_v28 }
 0x472   : > { %v1528_v31 = vpop.f32.mrf.mxu0  ;;  %v1606_v34 = vpop.f32.mrf.mxu1 }
 0x473   : > { %v1532_v33 = vadd.f32 %v1528_v31, %v1442_v30  ;;  %v1609_v37 = vadd.f32 %v1604_v32, %v1531_v38 }
 0x474   : > { %v1790_v40 = vpop.f32.mrf.mxu1 }
 0x475   : > { %v1610_v36 = vadd.f32 %v1606_v34, %v1532_v33 }
 0x476   : > { %v1792_v43 = vpop.f32.mrf.mxu1 }
 0x477   : > { %v1700_v35 = vpop.f32.mrf.mxu0 }
 0x478   : > { %v1705_v41 = vadd.f32 %v1700_v35, %v1609_v37 }
 0x479   : > { %v1702_v39 = vpop.f32.mrf.mxu0 }
 0x47a   : > { %v1706_v42 = vadd.f32 %v1702_v39, %v1610_v36  ;;  %v1795_v44 = vadd.f32 %v1790_v40, %v1705_v41 }
 0x47c   : > { %v1796_v46 = vadd.f32 %v1792_v43, %v1706_v42 }
 0x47f   : > { %v1878_v45 = vpop.f32.mrf.mxu0 }
 0x480   : > { %v1883_v48 = vadd.f32 %v1878_v45, %v1795_v44 }
 0x481   : > { %v1880_v47 = vpop.f32.mrf.mxu0 }
 0x482   : > { %v1884_v51 = vadd.f32 %v1880_v47, %v1796_v46 }
 0x484   : > { %v1968_v49 = vpop.f32.mrf.mxu1 }
 0x485   : > { %v1973_v52 = vadd.f32 %v1968_v49, %v1883_v48 }
 0x486   : > { %v1970_v53 = vpop.f32.mrf.mxu1 }
 0x487   : > { %v1974_v54 = vadd.f32 %v1970_v53, %v1884_v51  ;;  %v1981_v55 = vadd.f32 %v1979_v50, %v1973_v52 }
 0x489   : > { %v1982_v56 = vadd.f32 %v1979_v50, %v1974_v54  ;;  %v1986_v58 = vmul.f32 %v1981_v55, %v1981_v55 }
 0x48b   : > { %v1983_v57 = vadd.f32 %v1982_v56, %v1981_v55  ;;  %v1987_v59 = vmul.f32 %v1982_v56, %v1982_v56 }
 0x48d   : > { %1984 = vadd.xlane.f32.xlu0 %v1983_v57  ;;  %v1988_v60 = vadd.f32 %v1987_v59, %v1986_v58 }
 0x48f   : > { %1989 = vadd.xlane.f32.xlu1 %v1988_v60 }
 0x516   : > { %v1985_v62 = vpop.xlane.xlu0 %1984 }
 0x517   : > { %v1991_v63 = vmul.f32 0.00390625, %v1985_v62 }
 0x518   : > { %v1990_v1 = vpop.xlane.xlu1 %1989 }
 0x519   : > { %v1993_v2 = vmul.f32 %v1991_v63, %v1991_v63  ;;  %v1992_v3 = vmul.f32 0.00390625, %v1990_v1 }
 0x51b   : > { %v1994_v4 = vsub.f32 %v1992_v3, %v1993_v2 }
 0x51d   : > { %v1995_v25 = vadd.f32 1e-05, %v1994_v4 }
 0x51f   : > { %2242 = vrsqrt.f32 %v1995_v25 }
 0x52c   : > { %v2243_v6 = vpop.eup %2242 }
 0x52d   : > { %v1997_v26 = vmul.f32 %v2243_v6, %v2446_v13 }
 0x52f   : > { %2006 = vperm.xlu1 %2236, %v1997_v26   ;;  %v1998_v7 = vmul.f32 %v1997_v26, %v1991_v63 }
 0x531   : > { %2000 = vrot.lane.b32.xlu0 %v1998_v7, %s2310_s9 }
 0x5a3   : > { %v2001_v8 = vpop.permute.xlu0 %2000 }
 0x5a4   : > { %v2003_v9 = vsub.f32 %v2446_v13, %v2001_v8 }
 0x5a6   : > { %2013 = vperm.xlu0 %2237, %v2003_v9  }
 0x5aa   : > { %v2007_v10 = vpop.permute.xlu1 %2006 }
 0x5ab   : > { %v2009_v11 = vmul.f32 %v2007_v10, %v1981_v55  ;;  %v2010_v12 = vmul.f32 %v2007_v10, %v1982_v56 }
 0x621   : > { %v2014_v14 = vpop.permute.xlu0 %2013 }
 0x622   : > { %v2016_v15 = vadd.f32 %v2014_v14, %v2009_v11  ;;  %v2017_v16 = vadd.f32 %v2014_v14, %v2010_v12 }
 0x624   : > { %vm2018_vm0 = vcmp.ge.f32.partialorder %v2016_v15, 0.0  ;;  %vm2019_vm1 = vcmp.ge.f32.partialorder %v2017_v16, 0.0  ;;  %v2020_v0 = vmul.f32 0.01, %v2016_v15  ;;  %v2021_v17 = vmul.f32 0.01, %v2017_v16 }
 0x626   : > { %v2022_v13 = vsel %vm2018_vm0, %v2016_v15, %v2020_v0  ;;  %v2023_v18 = vsel %vm2019_vm1, %v2017_v16, %v2021_v17 }
 0x627   : > { %2024 = vst [vmem:[%s190_s12] sm:$0xff] %v2022_v13  ;;  %2025 = vst [vmem:[%s190_s12 + $0x8] sm:$0xff] %v2023_v18 }
 0x628   : > { %2257 = shalt.err (!%p2254_p3)
}
 0x629   : > { %s2258_s5 = scalar_lea.hbm %s2711_s23, 256  ;;  %s2262_s6 = scalar_lea.hbm %s2756_s4, 512 }
 0x62a   : > { %p2259_p4 = scmp.ne.s32.totalorder %s2711_s23, %s2258_s5  ;;  %p2263_p9 = scmp.lt.s32.totalorder %s2711_s23, %s2756_s4 }
 0x62b   : > { %p2264_p10 = scmp.lt.s32.totalorder %s2262_s6, %s2258_s5 }
 0x62c   : > { %p2260_p7 = pnand %p2259_p4, %p2385_p5 }
 0x62d   : > { %p2265_p11 = por %p2264_p10, %p2263_p9 }
 0x62e   : > { %p2261_p8 = pneg %p2260_p7 }
 0x630   : > { %p2266_p12 = pnand %p2265_p11, %p2261_p8 }
 0x632   : > { %2269 = shalt.err (!%p2266_p12)
}
 0x633   : > { %2178 = dma.vmem_to_hbm [thread:$0]  (%p2385_p5), %s2713_s13, 256, %s2711_s23, %s2027_s19  }
 0x634 PF: > { %p2184_p13 = scmp.ge.s32.totalorder %s2304_s18, 2  ;;  %s2053_s10 = sand.u32 1, %s2292_s15  }
 0x635   : > { %s2054_s11 = scalar_lea.sflag [#allocation5], %s2053_s10 }
 0x636   : > { %p2181_p0 = pnand %p2184_p13, %p2389_p6 }
 0x638   : > { %p2182_p1 = pneg %p2181_p0 }
 0x63a   : > { %2287 = dma.done.wait (%p2182_p1), %s2054_s11, 256  }
 0x63b   : > { %2289 = vsyncadd (%p2182_p1), %s2054_s11, 4294967040  ;;  %p14_p2 = scmp.ge.s32.totalorder %s2372_s21, 4   ;;  %s2767_s15 = smov %s2296_s16 }
 0x63c   : > { %s2768_s16 = smov %s2300_s17  ;;  %s2769_s17 = smov %s2383_s24 }
 0x63d   : > { %s2770_s18 = smov %s2372_s21  ;;  %16 = sbr.rel (!%p14_p2) target bundleno = 3 (0x3), region = 87 }
 0x642   :  { %2059 = vsyncpa [#allocation5], 1 }
 0x643   :  { %2061 = vsyncpa [#allocation5 + $0x1], 1 }

</bundles_post_ra>
